<compile_context>
chip_gen: v7x
topology: tpu7x:2x2x1
jax: 0.10.0
libtpu: 0.0.40
codegen_flags: <defaults>
</compile_context>

<pallas_src>
import functools

import jax
import jax.numpy as jnp
from jax import lax
from jax.experimental import pallas as pl
from jax.experimental.pallas import tpu as pltpu

HIDDEN = 30   # fixed by the module: Linear(d_in, 30)
_LANE = 128   # TPU vreg lane width

# Compat shim (older jax named it TPUCompilerParams).
_CompilerParams = getattr(pltpu, "CompilerParams",
                          getattr(pltpu, "TPUCompilerParams", None))


def _round_up(x, m):
    return (x + m - 1) // m * m


def _keep_mask(seed_u32, row0_u32, shape, *, salt, thresh_u32):
    """Boolean keep-mask with keep-prob = 1 - p_drop.

    One-round counter hash of (seed, global_row, col, salt): linear row/col
    mix + a single murmur-style finalizer round.  Pure 32-bit integer VPU ops,
    deterministic regardless of tiling; rare (row,col) collisions on the same
    linear-mix line are acceptable for dropout.
    """
    rows = row0_u32 + lax.broadcasted_iota(jnp.uint32, shape, 0)
    cols = lax.broadcasted_iota(jnp.uint32, shape, 1)
    h = (seed_u32 + jnp.uint32(salt)
         + rows * jnp.uint32(0x9E3779B1) + cols * jnp.uint32(0x85EBCA77))
    h = h ^ (h >> 16)
    h = h * jnp.uint32(0x85EBCA6B)
    h = h ^ (h >> 13)
    return h >= thresh_u32


def _nn_clf_dropout2_kernel(seed_ref, x_ref, w1_ref, b1_ref, w2_ref, b2_ref,
                            o_ref, *, p_drop, training, tile_n):
    # x streamed in its native dtype; cast to the (bf16) matmul dtype in vregs.
    x = x_ref[...].astype(w1_ref.dtype)            # (tile_n, d_in)

    apply_dropout = training and p_drop > 0.0
    if apply_dropout:
        # NOTE: p_drop ~ 1.0 clamps to keep-prob 2^-32 rather than exactly 0.
        thresh = jnp.uint32(min(int(round(p_drop * 4294967296.0)), 4294967295))
        seed = seed_ref[0].astype(jnp.uint32)
        row0 = (pl.program_id(0) * tile_n).astype(jnp.uint32)
        # dropout1 — 1/(1-p) scale is already folded into w1 by the wrapper.
        keep1 = _keep_mask(seed, row0, x.shape, salt=0x243F6A88,
                           thresh_u32=thresh)
        x = jnp.where(keep1, x, jnp.zeros_like(x))

    # lin1: (tile_n, d_in) @ (d_in, 128) + (1, 128)   [MXU, f32 accumulate]
    h = jnp.dot(x, w1_ref[...], preferred_element_type=jnp.float32) + b1_ref[...]
    h = jnp.maximum(h, 0.0)                        # ReLU

    if apply_dropout:
        # dropout2 — 1/(1-p) scale folded into w2 by the wrapper.
        keep2 = _keep_mask(seed, row0, h.shape, salt=0xB7E15162,
                           thresh_u32=thresh)
        h = jnp.where(keep2, h, 0.0)

    # lin2: (tile_n, 128) @ (128, d_out) + (1, d_out)   [MXU]
    z = jnp.dot(h.astype(w2_ref.dtype), w2_ref[...],
                preferred_element_type=jnp.float32) + b2_ref[...]
    o_ref[...] = z.astype(o_ref.dtype)             # unpadded (tile_n, d_out) store


def _choose_tile_n(n, d_in, x_itemsize):
    """Rows per grid step: ~4 MiB streamed x block, >=2 grid steps when n allows."""
    if n < 32:
        return n                                   # single block == full batch dim
    target = (4 << 20) // max(1, d_in * x_itemsize)        # ~4 MiB per x buffer
    vmem_cap = (8 << 20) // max(1, d_in * x_itemsize)      # 2 buffers <= ~16 MiB
    tile = max(512, min(8192, target))
    tile = min(tile, max(16, vmem_cap))
    tile = min(tile, max(16, n // 2))              # >= 2 steps for v7x's 2 TCs
    tile = max(16, tile // 16 * 16)                # bf16-friendly sublane multiple
    return tile


def nn_clf_dropout2_forward(x, params, seed, *, p_drop=0.3, training=True,
                            compute_dtype=jnp.bfloat16, tile_n=None):
    """Pallas implementation of NNClfDropout2.forward."""
    w1, b1, w2, b2 = params["w1"], params["b1"], params["w2"], params["b2"]
    n, d_in = x.shape
    hidden, d_out = w2.shape
    assert w1.shape == (d_in, hidden)

    f32 = jnp.float32
    cdt = jnp.dtype(compute_dtype)
    h_pad = _round_up(max(hidden, _LANE), _LANE)   # 30 -> 128 lanes (exact: zeros)

    # Fold inverted-dropout scales into the weights (training mode only), pad
    # hidden to 128 lanes, then cast to the matmul dtype.  Output columns stay
    # unpadded (d_out) so no padded writeback is needed.
    inv_keep = 1.0 / (1.0 - p_drop) if (training and p_drop > 0.0) else 1.0
    w1p = jnp.zeros((d_in, h_pad), f32).at[:, :hidden].set(
        w1.astype(f32) * inv_keep).astype(cdt)
    b1p = jnp.zeros((1, h_pad), f32).at[:, :hidden].set(
        b1.reshape(1, hidden).astype(f32))
    w2p = jnp.zeros((h_pad, d_out), f32).at[:hidden, :].set(
        w2.astype(f32) * inv_keep).astype(cdt)
    b2p = b2.reshape(1, d_out).astype(f32)

    # Batch tiling: no jnp.pad copy of x; ragged last tile handled by Pallas.
    x_itemsize = jnp.dtype(x.dtype).itemsize
    if tile_n is None:
        tile_n = _choose_tile_n(n, d_in, x_itemsize)
    else:
        tile_n = max(1, min(int(tile_n), n))
        if tile_n < n:
            tile_n = max(8, tile_n // 8 * 8)

    grid = (pl.cdiv(n, tile_n),)
    kernel = functools.partial(_nn_clf_dropout2_kernel,
                               p_drop=float(p_drop),
                               training=bool(training),
                               tile_n=int(tile_n))

    # VMEM budget: actual double-buffered footprint + headroom, <= 48 MiB so
    # v7x (64 MiB physical per TC) keeps compiler scratch headroom.
    w_itemsize = cdt.itemsize
    need = (2 * tile_n * d_in * x_itemsize          # x (double-buffered)
            + 2 * tile_n * d_out * 4                # out (double-buffered)
            + 2 * (d_in * h_pad + h_pad * d_out) * w_itemsize   # weights
            + 2 * (h_pad + d_out) * 4)              # biases
    vmem_limit = int(min(48 << 20, max(16 << 20, 2 * need)))

    extra = {}
    if _CompilerParams is not None:
        extra["compiler_params"] = _CompilerParams(
            dimension_semantics=("parallel",),      # megacore / v7x 2 TCs
            vmem_limit_bytes=vmem_limit)

    out = pl.pallas_call(
        kernel,
        out_shape=jax.ShapeDtypeStruct((n, d_out), f32),
        grid=grid,
        in_specs=[
            pl.BlockSpec(memory_space=pltpu.MemorySpace.SMEM),         # seed
            pl.BlockSpec((tile_n, d_in), lambda i: (i, 0)),            # x (streamed)
            pl.BlockSpec((d_in, h_pad), lambda i: (0, 0)),             # w1 (resident)
            pl.BlockSpec((1, h_pad), lambda i: (0, 0)),                # b1 (resident)
            pl.BlockSpec((h_pad, d_out), lambda i: (0, 0)),            # w2 (resident)
            pl.BlockSpec((1, d_out), lambda i: (0, 0)),                # b2 (resident)
        ],
        out_specs=pl.BlockSpec((tile_n, d_out), lambda i: (i, 0)),     # unpadded
        **extra,
    )(seed, x, w1p, b1p, w2p, b2p)

    return out


def init_params(key, d_in, d_out, dtype=jnp.float32):
    """Init matching torch.nn.Linear's U(-1/sqrt(fan_in), 1/sqrt(fan_in))."""
    k1, k2, k3, k4 = jax.random.split(key, 4)
    bound1 = 1.0 / jnp.sqrt(jnp.float32(d_in))
    bound2 = 1.0 / jnp.sqrt(jnp.float32(HIDDEN))
    return {
        "w1": jax.random.uniform(k1, (d_in, HIDDEN), dtype, -bound1, bound1),
        "b1": jax.random.uniform(k2, (1, HIDDEN), dtype, -bound1, bound1),
        "w2": jax.random.uniform(k3, (HIDDEN, d_out), dtype, -bound2, bound2),
        "b2": jax.random.uniform(k4, (1, d_out), dtype, -bound2, bound2),
    }


if __name__ == "__main__":
    key = jax.random.PRNGKey(0)
    k_x, k_p = jax.random.split(key)

    batch, d_in, d_out = 8, 32, 5
    x = jax.random.normal(k_x, (batch, d_in), jnp.float32)
    params = init_params(k_p, d_in, d_out)
    # Caller should vary `seed` per training step; mask is deterministic in it.
    seed = jnp.array([0], dtype=jnp.int32)

    # Training-mode forward (dropout active, bf16 MXU path — default).
    out_train = jax.block_until_ready(
        nn_clf_dropout2_forward(x, params, seed, p_drop=0.3, training=True))

    # Eval-mode forward, exact f32 path — check against pure-JAX reference.
    out_eval_f32 = jax.block_until_ready(
        nn_clf_dropout2_forward(x, params, seed, p_drop=0.3, training=False,
                                compute_dtype=jnp.float32))

    # Eval-mode forward, default bf16 MXU path — loose-tolerance check.
    out_eval_bf16 = jax.block_until_ready(
        nn_clf_dropout2_forward(x, params, seed, p_drop=0.3, training=False))

    h_ref = jnp.maximum(x @ params["w1"] + params["b1"], 0.0)
    ref = h_ref @ params["w2"] + params["b2"]

    assert out_train.shape == (batch, d_out)
    assert bool(jnp.all(jnp.isfinite(out_train)))
    assert out_eval_f32.shape == (batch, d_out)
    assert jnp.allclose(out_eval_f32, ref, atol=1e-5, rtol=1e-5)
    assert jnp.allclose(out_eval_bf16, ref, atol=1e-1, rtol=5e-2)

    print("KERNEL_OK")
</pallas_src>

<mosaic_0001>
module attributes {stable_mosaic.version = 11 : i64} {
  func.func @_nn_clf_dropout2_kernel(%arg0: i32, %arg1: memref<1xi32, #tpu.memory_space<smem>>, %arg2: memref<8x32xf32, #tpu.memory_space<vmem>>, %arg3: memref<32x128xbf16, #tpu.memory_space<vmem>>, %arg4: memref<1x128xf32, #tpu.memory_space<vmem>>, %arg5: memref<128x5xbf16, #tpu.memory_space<vmem>>, %arg6: memref<1x5xf32, #tpu.memory_space<vmem>>, %arg7: memref<8x5xf32, #tpu.memory_space<vmem>>) attributes {dimension_semantics = [#tpu.dimension_semantics<parallel>], iteration_bounds = array<i64: 1>, scalar_prefetch = 0 : i64, scratch_operands = 0 : i64, tpu.core_type = #tpu.core_type<tc>, window_params = [{transform_indices = @transform_0, window_bounds = array<i64: 1>}, {transform_indices = @transform_1, window_bounds = array<i64: 8, 32>}, {pipeline_mode = #tpu.pipeline_mode<synchronous>, transform_indices = @transform_2, window_bounds = array<i64: 32, 128>}, {pipeline_mode = #tpu.pipeline_mode<synchronous>, transform_indices = @transform_3, window_bounds = array<i64: 1, 128>}, {pipeline_mode = #tpu.pipeline_mode<synchronous>, transform_indices = @transform_4, window_bounds = array<i64: 128, 5>}, {pipeline_mode = #tpu.pipeline_mode<synchronous>, transform_indices = @transform_5, window_bounds = array<i64: 1, 5>}, {transform_indices = @transform_6, window_bounds = array<i64: 8, 5>}]} {
    %c0 = arith.constant 0 : index
    %c0_0 = arith.constant 0 : index
    %0 = vector.load %arg2[%c0, %c0_0] : memref<8x32xf32, #tpu.memory_space<vmem>>, vector<8x32xf32>
    %1 = arith.truncf %0 : vector<8x32xf32> to vector<8x32xbf16>
    %c0_1 = arith.constant 0 : index
    %2 = memref.load %arg1[%c0_1] : memref<1xi32, #tpu.memory_space<smem>>
    %c8_i32 = arith.constant 8 : i32
    %3 = arith.muli %arg0, %c8_i32 : i32
    %4 = tpu.iota {dimensions = array<i32: 0>} : vector<8x32xi32>
    %5 = vector.broadcast %3 : i32 to vector<8x32xi32>
    %6 = arith.addi %5, %4 : vector<8x32xi32>
    %7 = tpu.iota {dimensions = array<i32: 1>} : vector<8x32xi32>
    %c608135816_i32 = arith.constant 608135816 : i32
    %8 = arith.addi %2, %c608135816_i32 : i32
    %c-1640531535_i32 = arith.constant -1640531535 : i32
    %9 = vector.broadcast %c-1640531535_i32 : i32 to vector<8x32xi32>
    %10 = arith.muli %6, %9 : vector<8x32xi32>
    %11 = vector.broadcast %8 : i32 to vector<8x32xi32>
    %12 = arith.addi %11, %10 : vector<8x32xi32>
    %c-2048144777_i32 = arith.constant -2048144777 : i32
    %13 = vector.broadcast %c-2048144777_i32 : i32 to vector<8x32xi32>
    %14 = arith.muli %7, %13 : vector<8x32xi32>
    %15 = arith.addi %12, %14 : vector<8x32xi32>
    %c16_i32 = arith.constant 16 : i32
    %16 = vector.broadcast %c16_i32 : i32 to vector<8x32xi32>
    %17 = arith.shrui %15, %16 : vector<8x32xi32>
    %18 = arith.xori %15, %17 : vector<8x32xi32>
    %c-2048144789_i32 = arith.constant -2048144789 : i32
    %19 = vector.broadcast %c-2048144789_i32 : i32 to vector<8x32xi32>
    %20 = arith.muli %18, %19 : vector<8x32xi32>
    %c13_i32 = arith.constant 13 : i32
    %21 = vector.broadcast %c13_i32 : i32 to vector<8x32xi32>
    %22 = arith.shrui %20, %21 : vector<8x32xi32>
    %23 = arith.xori %20, %22 : vector<8x32xi32>
    %c1288490189_i32 = arith.constant 1288490189 : i32
    %24 = vector.broadcast %c1288490189_i32 : i32 to vector<8x32xi32>
    %25 = arith.cmpi uge, %23, %24 : vector<8x32xi32>
    %cst = arith.constant 0.000000e+00 : bf16
    %26 = vector.broadcast %cst : bf16 to vector<8x32xbf16>
    %27 = arith.select %25, %1, %26 : vector<8x32xi1>, vector<8x32xbf16>
    %c0_2 = arith.constant 0 : index
    %c0_3 = arith.constant 0 : index
    %28 = vector.load %arg3[%c0_2, %c0_3] : memref<32x128xbf16, #tpu.memory_space<vmem>>, vector<32x128xbf16>
    %cst_4 = arith.constant dense<0.000000e+00> : vector<8x128xf32>
    %29 = tpu.matmul %27, %28, %cst_4 {dimension_numbers = #tpu.dot_dimension_numbers<[1], [0], [0], [1], [0, 0, 1, 1], [], []>} : vector<8x32xbf16>, vector<32x128xbf16>, vector<8x128xf32> -> vector<8x128xf32>
    %c0_5 = arith.constant 0 : index
    %c0_6 = arith.constant 0 : index
    %30 = vector.load %arg4[%c0_5, %c0_6] : memref<1x128xf32, #tpu.memory_space<vmem>>, vector<1x128xf32>
    %31 = vector.broadcast %30 : vector<1x128xf32> to vector<8x128xf32>
    %32 = arith.addf %29, %31 : vector<8x128xf32>
    %cst_7 = arith.constant 0.000000e+00 : f32
    %33 = vector.broadcast %cst_7 : f32 to vector<8x128xf32>
    %34 = arith.maximumf %32, %33 : vector<8x128xf32>
    %35 = tpu.iota {dimensions = array<i32: 0>} : vector<8x128xi32>
    %36 = vector.broadcast %3 : i32 to vector<8x128xi32>
    %37 = arith.addi %36, %35 : vector<8x128xi32>
    %38 = tpu.iota {dimensions = array<i32: 1>} : vector<8x128xi32>
    %c-1209970334_i32 = arith.constant -1209970334 : i32
    %39 = arith.addi %2, %c-1209970334_i32 : i32
    %c-1640531535_i32_8 = arith.constant -1640531535 : i32
    %40 = vector.broadcast %c-1640531535_i32_8 : i32 to vector<8x128xi32>
    %41 = arith.muli %37, %40 : vector<8x128xi32>
    %42 = vector.broadcast %39 : i32 to vector<8x128xi32>
    %43 = arith.addi %42, %41 : vector<8x128xi32>
    %c-2048144777_i32_9 = arith.constant -2048144777 : i32
    %44 = vector.broadcast %c-2048144777_i32_9 : i32 to vector<8x128xi32>
    %45 = arith.muli %38, %44 : vector<8x128xi32>
    %46 = arith.addi %43, %45 : vector<8x128xi32>
    %c16_i32_10 = arith.constant 16 : i32
    %47 = vector.broadcast %c16_i32_10 : i32 to vector<8x128xi32>
    %48 = arith.shrui %46, %47 : vector<8x128xi32>
    %49 = arith.xori %46, %48 : vector<8x128xi32>
    %c-2048144789_i32_11 = arith.constant -2048144789 : i32
    %50 = vector.broadcast %c-2048144789_i32_11 : i32 to vector<8x128xi32>
    %51 = arith.muli %49, %50 : vector<8x128xi32>
    %c13_i32_12 = arith.constant 13 : i32
    %52 = vector.broadcast %c13_i32_12 : i32 to vector<8x128xi32>
    %53 = arith.shrui %51, %52 : vector<8x128xi32>
    %54 = arith.xori %51, %53 : vector<8x128xi32>
    %c1288490189_i32_13 = arith.constant 1288490189 : i32
    %55 = vector.broadcast %c1288490189_i32_13 : i32 to vector<8x128xi32>
    %56 = arith.cmpi uge, %54, %55 : vector<8x128xi32>
    %cst_14 = arith.constant 0.000000e+00 : f32
    %57 = vector.broadcast %cst_14 : f32 to vector<8x128xf32>
    %58 = arith.select %56, %34, %57 : vector<8x128xi1>, vector<8x128xf32>
    %59 = arith.truncf %58 : vector<8x128xf32> to vector<8x128xbf16>
    %c0_15 = arith.constant 0 : index
    %c0_16 = arith.constant 0 : index
    %60 = vector.load %arg5[%c0_15, %c0_16] : memref<128x5xbf16, #tpu.memory_space<vmem>>, vector<128x5xbf16>
    %cst_17 = arith.constant dense<0.000000e+00> : vector<8x5xf32>
    %61 = tpu.matmul %59, %60, %cst_17 {dimension_numbers = #tpu.dot_dimension_numbers<[1], [0], [0], [1], [0, 0, 1, 1], [], []>} : vector<8x128xbf16>, vector<128x5xbf16>, vector<8x5xf32> -> vector<8x5xf32>
    %c0_18 = arith.constant 0 : index
    %c0_19 = arith.constant 0 : index
    %62 = vector.load %arg6[%c0_18, %c0_19] : memref<1x5xf32, #tpu.memory_space<vmem>>, vector<1x5xf32>
    %63 = vector.broadcast %62 : vector<1x5xf32> to vector<8x5xf32>
    %64 = arith.addf %61, %63 : vector<8x5xf32>
    %c0_20 = arith.constant 0 : index
    %c0_21 = arith.constant 0 : index
    %65 = vector.load %arg7[%c0_20, %c0_21] : memref<8x5xf32, #tpu.memory_space<vmem>>, vector<8x5xf32>
    tpu.vector_store %arg7[%c0_20, %c0_21], %64 {strides = array<i32>} : memref<8x5xf32, #tpu.memory_space<vmem>>, vector<8x5xf32>,
    return
  }
  func.func @transform_0(%arg0: i32) -> i32 {
    %c0_i32 = arith.constant 0 : i32
    %c0_i32_0 = arith.constant 0 : i32
    return %c0_i32 : i32
  }
  func.func @transform_1(%arg0: i32) -> (i32, i32) {
    %c0_i32 = arith.constant 0 : i32
    %c0_i32_0 = arith.constant 0 : i32
    return %arg0, %c0_i32 : i32, i32
  }
  func.func @transform_2(%arg0: i32) -> (i32, i32) {
    %c0_i32 = arith.constant 0 : i32
    %c0_i32_0 = arith.constant 0 : i32
    %c0_i32_1 = arith.constant 0 : i32
    return %c0_i32, %c0_i32_0 : i32, i32
  }
  func.func @transform_3(%arg0: i32) -> (i32, i32) {
    %c0_i32 = arith.constant 0 : i32
    %c0_i32_0 = arith.constant 0 : i32
    %c0_i32_1 = arith.constant 0 : i32
    return %c0_i32, %c0_i32_0 : i32, i32
  }
  func.func @transform_4(%arg0: i32) -> (i32, i32) {
    %c0_i32 = arith.constant 0 : i32
    %c0_i32_0 = arith.constant 0 : i32
    %c0_i32_1 = arith.constant 0 : i32
    return %c0_i32, %c0_i32_0 : i32, i32
  }
  func.func @transform_5(%arg0: i32) -> (i32, i32) {
    %c0_i32 = arith.constant 0 : i32
    %c0_i32_0 = arith.constant 0 : i32
    %c0_i32_1 = arith.constant 0 : i32
    return %c0_i32, %c0_i32_0 : i32, i32
  }
  func.func @transform_6(%arg0: i32) -> (i32, i32) {
    %c0_i32 = arith.constant 0 : i32
    %c0_i32_0 = arith.constant 0 : i32
    return %arg0, %c0_i32 : i32, i32
  }
}

</mosaic_0001>

<bundles_post_ra>
// kernel: tpu_custom_call.1
= control target key start
LH: loop header
LB: loop body
LE: loop exit
PB: predicated region body
PF: predicated region fallthrough
CT: control target
= control target key end

     0   :  { %v30_v1 = vlaneseq  ;;  %v350_v2 = vmov 0.0   ;;  %vm351_vm0 = vmmov 0   ;;  %s445_s0 = inlined_call_operand.<no memory space> [shape: s32[1], index: 0, kind: input, shape index: {}]   ;;  %s446_s1 = inlined_call_operand.vmem [shape: f32[8,32], index: 1, kind: input, shape index: {}]   ;;  %s447_s2 = inlined_call_operand.vmem [shape: bf16[32,128], index: 2, kind: input, shape index: {}]   ;;  %s448_s3 = inlined_call_operand.vmem [shape: f32[1,128], index: 3, kind: input, shape index: {}]   ;;  %s449_s4 = inlined_call_operand.vmem [shape: bf16[128,5], index: 4, kind: input, shape index: {}]   ;;  %s450_s5 = inlined_call_operand.vmem [shape: f32[1,5], index: 5, kind: input, shape index: {}]   ;;  %s451_s6 = inlined_call_operand.hbm [shape: f32[8,5], index: 6, kind: output, shape index: {}]  }
   0x1   :  { %v316_v0 = vld [vmem:[%s447_s2] sm:$0xff]   ;;  %285 = vmatprep.subr.bf16.mxu0 %v350_v2  ;;  %293 = vmatprep.subr.bf16.mxu1 %v350_v2  ;;  %v317_v3 = vld [vmem:[%s447_s2 + $0x8] sm:$0xff]   ;;  %s36_s27 = sadd.s32 608135816, %s445_s0  ;;  %v320_v13 = vld [vmem:[%s449_s4 + $0x10] sm:$0xff]  }
   0x2   :  { %286 = vmatpush3.bf16.msra.mxu0 %v316_v0  ;;  %289 = vmatprep.mubr.msk.bf16.mxu0 %vm351_vm0, %v350_v2  ;;  %v31_v4 = vshrl.u32 %v30_v1, 7  ;;  %v35_v5 = vand.u32 127, %v30_v1  ;;  %v38_v6 = vstv %s36_s27  ;;  %v318_v7 = vld [vmem:[%s449_s4] sm:$0xff]   ;;  %v319_v10 = vld [vmem:[%s449_s4 + $0x8] sm:$0xff]  }
   0x3   :  { %287 = vmatprep.subr.bf16.mxu0 %v350_v2  ;;  %309 = vmatprep.mubr.msk.bf16.mxu1 %vm351_vm0, %v350_v2 }
   0x4   :  { %v37_v8 = vmul.u32 2654435761, %v31_v4  ;;  %v40_v9 = vmul.u32 2246822519, %v35_v5  ;;  %294 = vmatpush3.bf16.msra.mxu1 %v318_v7 }
   0x5   :  { %295 = vmatprep.subr.bf16.mxu1 %v350_v2 }
   0x6   :  { %288 = vmatpush3.bf16.msra.mxu0 %v317_v3  ;;  %v39_v11 = vadd.s32 %v38_v6, %v37_v8 }
   0x8   :  { %v41_v12 = vadd.s32 %v40_v9, %v39_v11  ;;  %296 = vmatpush3.bf16.msra.mxu1 %v319_v10 }
   0x9   :  { %297 = vmatprep.subr.bf16.mxu1 %v350_v2 }
   0xa   :  { %v42_v14 = vshrl.u32 %v41_v12, 16 }
   0xb   :  { %12 = vsyncpa [#allocation4], 0  ;;  %v321_v16 = vld [vmem:[%s449_s4 + $0x18] sm:$0xff]   ;;  %v26_v18 = vld [vmem:[%s446_s1] sm:$0xff]  ;;  %vm73_vm2 = vcmask 261120   ;;  %s352_s25 = smov [#allocation3]  }
   0xc   :  { %v43_v15 = vxor.u32 %v42_v14, %v41_v12  ;;  %298 = vmatpush3.bf16.msra.mxu1 %v320_v13  ;;  %v322_v20 = vld [vmem:[%s449_s4 + $0x20] sm:$0xff]   ;;  %v27_v21 = vpack.c.bf16 %v26_v18, %v26_v18  ;;  %v323_v23 = vld [vmem:[%s449_s4 + $0x28] sm:$0xff]   ;;  %v324_v25 = vld [vmem:[%s449_s4 + $0x30] sm:$0xff]   ;;  %s118_s22 = sadd.s32 3084996962, %s445_s0  ;;  %s249_s26 = sshll.u32 %s352_s25, 4  ;;  %s250_s26 = int_to_ptr.vmem [resolvable:$true] %s249_s26 }
   0xd   :  { %299 = vmatprep.subr.bf16.mxu1 %v350_v2  ;;  %v325_v26 = vld [vmem:[%s449_s4 + $0x38] sm:$0xff]   ;;  %v119_v27 = vstv %s118_s22  ;;  %v257_v35 = vld [vmem:[%s448_s3] ss:$0 sm:$0xff]  ;;  %vm241_vm6 = vcmask 39936   ;;  %s326_s3 = scalar_lea.vmem %s250_s26, 128  ;;  %p331_p1 = scmp.lt.s32.totalorder %s250_s26, %s250_s26 }
   0xe   :  { %v44_v17 = vmul.u32 2246822507, %v43_v15  ;;  %v120_v28 = vadd.s32 %v119_v27, %v37_v8  ;;  %v261_v43 = vld [vmem:[%s450_s5] ss:$0 sm:$0xff]  ;;  %p327_p0 = scmp.ne.s32.totalorder %s250_s26, %s326_s3  ;;  %p332_p2 = scmp.lt.s32.totalorder %s326_s3, %s326_s3 }
  0x10   :  { %v45_v19 = vshrl.u32 %v44_v17, 13  ;;  %300 = vmatpush3.bf16.msra.mxu1 %v321_v16  ;;  %v121_v29 = vadd.s32 %v120_v28, %v40_v9  ;;  %p333_p3 = por %p332_p2, %p331_p1 }
  0x11   :  { %301 = vmatprep.subr.bf16.mxu1 %v350_v2 }
  0x12   :  { %v46_v22 = vxor.u32 %v45_v19, %v44_v17  ;;  %v122_v30 = vshrl.u32 %v121_v29, 16  ;;  %p334_p4 = pnand %p333_p3, %p327_p0 }
  0x14   :  { %vm47_vm1 = vcmp.ge.u32.totalorder %v46_v22, 1288490189  ;;  %302 = vmatpush3.bf16.msra.mxu1 %v322_v20  ;;  %v123_v31 = vxor.u32 %v122_v30, %v121_v29 }
  0x15   :  { %vm48_vm3 = vmpackc.low %vm47_vm1, %vm47_vm1  ;;  %303 = vmatprep.subr.bf16.mxu1 %v350_v2 }
  0x16   :  { %v49_v24 = vsel %vm48_vm3, %v27_v21, 0  ;;  %v124_v32 = vmul.u32 2246822507, %v123_v31 }
  0x17   :  { %290 = vmatmul.mubr.msk.bf16.vlgmr.msra.gmra.mrb[0].mxu0 %vm73_vm2, %v49_v24 }
  0x18   :  { %304 = vmatpush3.bf16.msra.mxu1 %v323_v23  ;;  %v125_v33 = vshrl.u32 %v124_v32, 13 }
  0x19   :  { %305 = vmatprep.subr.bf16.mxu1 %v350_v2 }
  0x1a   :  { %v126_v34 = vxor.u32 %v125_v33, %v124_v32 }
  0x1c   :  { %306 = vmatpush3.bf16.msra.mxu1 %v324_v25  ;;  %vm127_vm4 = vcmp.ge.u32.totalorder %v126_v34, 1288490189 }
  0x1d   :  { %307 = vmatprep.subr.bf16.mxu1 %v350_v2  ;;  %vm270_vm5 = vmpackc.low %vm127_vm4, %vm127_vm4 }
  0x20   :  { %308 = vmatpush3.bf16.msra.mxu1 %v325_v26 }
  0xea   :  { %v111_v36 = vpop.f32.mrb[0].mxu0 }
  0xeb   :  { %v112_v37 = vadd.f32 %v257_v35, %v111_v36  ;;  %v291_v38 = vpop.f32.mrb[1].mxu0 }
  0xec   :  { %v114_v39 = vpop.f32.mrb[2].mxu0 }
  0xed   :  { %v117_v40 = vmax.f32 %v112_v37, 0.0  ;;  %v292_v41 = vpop.f32.mrb[3].mxu0 }
  0xef   :  { %v271_v42 = vpack.c.bf16 %v117_v40, %v117_v40 }
  0xf1   :  { %310 = vmatmul.mubr.msk.bf16.vlgmr.msra.gmra.mrb[0].mxu1 %vm270_vm5, %v271_v42 }
 0x1c4   :  { %v235_v44 = vpop.f32.mrb[0].mxu1 }
 0x1c5   :  { %v236_v45 = vadd.f32 %v261_v43, %v235_v44  ;;  %v311_v46 = vpop.f32.mrb[1].mxu1 }
 0x1c6   :  { %v238_v47 = vpop.f32.mrb[2].mxu1 }
 0x1c7   :  { %v312_v48 = vpop.f32.mrb[3].mxu1  ;;  %242 = vst.msk [vmem:[#allocation3] sm:$0xff] %vm241_vm6, %v236_v45 }
 0x1c8   :  { %337 = shalt.err (!%p334_p4)
}
 0x1c9   :  { %s338_s5 = scalar_lea.hbm %s451_s6, 128 }
 0x1ca   :  { %p339_p5 = scmp.ne.s32.totalorder %s451_s6, %s338_s5  ;;  %p342_p6 = scmp.lt.u32.totalorder %s338_s5, %s451_s6 }
 0x1cc   :  { %p344_p7 = pnand %p342_p6, %p339_p5 }
 0x1ce   :  { %347 = shalt.err (!%p344_p7)
}
 0x1cf   :  { %252 = dma.vmem_to_hbm [thread:$0]  %s250_s26, 128, %s451_s6, [#allocation4]  }
 0x1d0   :  { %348 = dma.done.wait [#allocation4], 128  }
 0x1d1   :  { %349 = vsyncadd [#allocation4], 4294967168 }
 0x1d2   :  { %256 = vsyncpa [#allocation4], 1 }

</bundles_post_ra>
